<compile_context>
chip_gen: v7x
topology: tpu7x:2x2x1
jax: 0.10.0
libtpu: 0.0.40
codegen_flags: <defaults>
</compile_context>

<pallas_src>
import functools

import jax
import jax.numpy as jnp
from jax.experimental import pallas as pl
from jax.experimental.pallas import tpu as pltpu


def _round_up(x, m):
    return ((x + m - 1) // m) * m


def _sigmoid_exact(z):
    # Single EUP tanh; exact sigmoid: 1/(1+e^-z) == 0.5*(tanh(z/2)+1).
    return 0.5 * (jnp.tanh(0.5 * z) + 1.0)


def _sir_mlp_kernel(layers, input_dim, matmul_dtype, x_ref, w0_ref, b0_ref,
                    w1_ref, b1_ref, w2_ref, b2_ref, o_ref):
    # Feature-major: x_ref is (input_dim, TB); weights are (out_f, in_f);
    # biases are (out_f, 1); o_ref is (out_dim, TB).
    x = x_ref[...]
    w0 = w0_ref[...]
    b0 = b0_ref[...]
    w1 = w1_ref[...]
    b1 = b1_ref[...]
    w2 = w2_ref[...]
    b2 = b2_ref[...]

    if matmul_dtype is not None:
        # v6e/v7x: bf16 MXU operands, f32 accumulation (~3x fewer MXU passes).
        w1 = w1.astype(matmul_dtype)
        w2 = w2.astype(matmul_dtype)

    # First linear.  For input_dim == 1 this is an outer product: do it on
    # the VPU (broadcast mul + add) instead of a K=1 MXU matmul.
    if input_dim == 1:
        h = w0 * x + b0                       # (H,1)*(1,TB) + (H,1) -> (H,TB)
    else:
        h = jnp.dot(w0, x, preferred_element_type=jnp.float32) + b0

    # `layers` repetitions of the *shared* fca block: Linear(H,H) -> Sigmoid.
    # (H,1) bias broadcasts per layer -- cheaper than a hoisted (H,TB) temp
    # at large TB with only a couple of iterations.
    for _ in range(layers):
        hm = h.astype(matmul_dtype) if matmul_dtype is not None else h
        z = jnp.dot(w1, hm, preferred_element_type=jnp.float32) + b1
        h = _sigmoid_exact(z)

    # Output linear: (out_dim, H) @ (H, TB) + (out_dim, 1).
    hm = h.astype(matmul_dtype) if matmul_dtype is not None else h
    o_ref[...] = (jnp.dot(w2, hm, preferred_element_type=jnp.float32)
                  + b2).astype(o_ref.dtype)


def sir_network_forward(x, params, *, layers=2, block_b=16384,
                        matmul_dtype=None):
    """SIRNetwork forward pass; x is (B, input_dim); returns (s_N, i_N, r_N)."""
    w0, b0, w1, b1, w2, b2 = params          # feature-major (out_f, in_f)
    B, input_dim = x.shape
    out_dim = w2.shape[0]

    # Feature-major: (input_dim, B), pad batch to a lane-aligned tile multiple.
    Bp128 = _round_up(B, 128)
    TB = min(block_b, Bp128)
    # For big batches keep at least 2 grid steps so both v7x TensorCores work.
    if Bp128 >= 4096:
        TB = min(TB, _round_up(pl.cdiv(Bp128, 2), 128))
    Bp = _round_up(Bp128, TB)

    xt = x.T.astype(jnp.float32)
    if Bp != B:
        xt = jnp.pad(xt, ((0, 0), (0, Bp - B)))

    grid = (pl.cdiv(Bp, TB),)

    # Batch-tiled specs for x / out; constant index_map keeps the ~1 KB of
    # weights resident in VMEM across all grid steps.
    x_spec = pl.BlockSpec((input_dim, TB), lambda i: (0, i))
    out_spec = pl.BlockSpec((out_dim, TB), lambda i: (0, i))
    resident = lambda a: pl.BlockSpec(a.shape, lambda i: (0, 0))

    out_t = pl.pallas_call(
        functools.partial(_sir_mlp_kernel, layers, input_dim, matmul_dtype),
        out_shape=jax.ShapeDtypeStruct((out_dim, Bp), jnp.float32),
        grid=grid,
        in_specs=[
            x_spec,
            resident(w0), resident(b0),
            resident(w1), resident(b1),
            resident(w2), resident(b2),
        ],
        out_specs=out_spec,
        compiler_params=pltpu.CompilerParams(
            dimension_semantics=("parallel",),
            # Headroom for the larger tiles (double-buffered x/out tiles plus
            # the (16,TB) f32 activations); safe on v5e/v6e (128 MiB) and v7x
            # (64 MiB physical).
            vmem_limit_bytes=32 * 1024 * 1024),
    )(xt, w0, b0, w1, b1, w2, b2)

    # Glue: slice rows of the (out_dim, Bp) result directly.  A (1,B)->(B,1)
    # reshape is free; no full-output transpose.
    s_N = out_t[0:1, :B].reshape(B, 1)
    i_N = out_t[1:2, :B].reshape(B, 1)
    r_N = out_t[2:3, :B].reshape(B, 1)
    return s_N, i_N, r_N


def init_params(key, input_dim=1, hidden=10, output=3):
    """Deterministic synthetic parameters, PyTorch-Linear layout (out, in)."""
    k0, k1, k2, k3, k4, k5 = jax.random.split(key, 6)
    w0 = jax.random.normal(k0, (hidden, input_dim), jnp.float32) * 0.5
    b0 = jax.random.normal(k1, (hidden, 1), jnp.float32) * 0.1
    w1 = jax.random.normal(k2, (hidden, hidden), jnp.float32) * 0.5
    b1 = jax.random.normal(k3, (hidden, 1), jnp.float32) * 0.1
    w2 = jax.random.normal(k4, (output, hidden), jnp.float32) * 0.5
    b2 = jax.random.normal(k5, (output, 1), jnp.float32) * 0.1
    return (w0, b0, w1, b1, w2, b2)


def _reference_forward(x, params, layers=2):
    w0, b0, w1, b1, w2, b2 = params
    h = x @ w0.T + b0.T
    for _ in range(layers):
        h = jax.nn.sigmoid(h @ w1.T + b1.T)
    out = h @ w2.T + b2.T
    return out[:, 0:1], out[:, 1:2], out[:, 2:3]


if __name__ == "__main__":
    key = jax.random.PRNGKey(0)
    pkey, xkey = jax.random.split(key)

    B, INPUT, HIDDEN, OUTPUT, LAYERS = 200, 1, 10, 3, 2
    params = init_params(pkey, input_dim=INPUT, hidden=HIDDEN, output=OUTPUT)
    x = jax.random.uniform(xkey, (B, INPUT), jnp.float32)  # e.g. time points t

    s_N, i_N, r_N = sir_network_forward(x, params, layers=LAYERS)
    jax.block_until_ready((s_N, i_N, r_N))

    # Sanity check against a pure-JAX reference of the same math (f32 path).
    s_r, i_r, r_r = _reference_forward(x, params, layers=LAYERS)
    assert s_N.shape == (B, 1) and i_N.shape == (B, 1) and r_N.shape == (B, 1)
    assert jnp.allclose(s_N, s_r, atol=1e-5)
    assert jnp.allclose(i_N, i_r, atol=1e-5)
    assert jnp.allclose(r_N, r_r, atol=1e-5)

    print("KERNEL_OK")
</pallas_src>

<mosaic_0001>
module attributes {stable_mosaic.version = 11 : i64} {
  func.func @_sir_mlp_kernel(%arg0: i32, %arg1: memref<1x256xf32, #tpu.memory_space<vmem>>, %arg2: memref<10x1xf32, #tpu.memory_space<vmem>>, %arg3: memref<10x1xf32, #tpu.memory_space<vmem>>, %arg4: memref<10x10xf32, #tpu.memory_space<vmem>>, %arg5: memref<10x1xf32, #tpu.memory_space<vmem>>, %arg6: memref<3x10xf32, #tpu.memory_space<vmem>>, %arg7: memref<3x1xf32, #tpu.memory_space<vmem>>, %arg8: memref<3x256xf32, #tpu.memory_space<vmem>>) attributes {dimension_semantics = [#tpu.dimension_semantics<parallel>], iteration_bounds = array<i64: 1>, scalar_prefetch = 0 : i64, scratch_operands = 0 : i64, tpu.core_type = #tpu.core_type<tc>, window_params = [{transform_indices = @transform_0, window_bounds = array<i64: 1, 256>}, {pipeline_mode = #tpu.pipeline_mode<synchronous>, transform_indices = @transform_1, window_bounds = array<i64: 10, 1>}, {pipeline_mode = #tpu.pipeline_mode<synchronous>, transform_indices = @transform_2, window_bounds = array<i64: 10, 1>}, {pipeline_mode = #tpu.pipeline_mode<synchronous>, transform_indices = @transform_3, window_bounds = array<i64: 10, 10>}, {pipeline_mode = #tpu.pipeline_mode<synchronous>, transform_indices = @transform_4, window_bounds = array<i64: 10, 1>}, {pipeline_mode = #tpu.pipeline_mode<synchronous>, transform_indices = @transform_5, window_bounds = array<i64: 3, 10>}, {pipeline_mode = #tpu.pipeline_mode<synchronous>, transform_indices = @transform_6, window_bounds = array<i64: 3, 1>}, {transform_indices = @transform_7, window_bounds = array<i64: 3, 256>}]} {
    %c0 = arith.constant 0 : index
    %c0_0 = arith.constant 0 : index
    %0 = vector.load %arg1[%c0, %c0_0] : memref<1x256xf32, #tpu.memory_space<vmem>>, vector<1x256xf32>
    %c0_1 = arith.constant 0 : index
    %c0_2 = arith.constant 0 : index
    %1 = vector.load %arg2[%c0_1, %c0_2] : memref<10x1xf32, #tpu.memory_space<vmem>>, vector<10x1xf32>
    %c0_3 = arith.constant 0 : index
    %c0_4 = arith.constant 0 : index
    %2 = vector.load %arg3[%c0_3, %c0_4] : memref<10x1xf32, #tpu.memory_space<vmem>>, vector<10x1xf32>
    %c0_5 = arith.constant 0 : index
    %c0_6 = arith.constant 0 : index
    %3 = vector.load %arg4[%c0_5, %c0_6] : memref<10x10xf32, #tpu.memory_space<vmem>>, vector<10x10xf32>
    %c0_7 = arith.constant 0 : index
    %c0_8 = arith.constant 0 : index
    %4 = vector.load %arg5[%c0_7, %c0_8] : memref<10x1xf32, #tpu.memory_space<vmem>>, vector<10x1xf32>
    %c0_9 = arith.constant 0 : index
    %c0_10 = arith.constant 0 : index
    %5 = vector.load %arg6[%c0_9, %c0_10] : memref<3x10xf32, #tpu.memory_space<vmem>>, vector<3x10xf32>
    %c0_11 = arith.constant 0 : index
    %c0_12 = arith.constant 0 : index
    %6 = vector.load %arg7[%c0_11, %c0_12] : memref<3x1xf32, #tpu.memory_space<vmem>>, vector<3x1xf32>
    %7 = vector.broadcast %1 : vector<10x1xf32> to vector<10x256xf32>
    %8 = vector.broadcast %0 : vector<1x256xf32> to vector<10x256xf32>
    %9 = arith.mulf %7, %8 : vector<10x256xf32>
    %10 = vector.broadcast %2 : vector<10x1xf32> to vector<10x256xf32>
    %11 = arith.addf %9, %10 : vector<10x256xf32>
    %cst = arith.constant dense<0.000000e+00> : vector<10x256xf32>
    %12 = tpu.matmul %3, %11, %cst {dimension_numbers = #tpu.dot_dimension_numbers<[1], [0], [0], [1], [0, 0, 1, 1], [], []>} : vector<10x10xf32>, vector<10x256xf32>, vector<10x256xf32> -> vector<10x256xf32>
    %13 = vector.broadcast %4 : vector<10x1xf32> to vector<10x256xf32>
    %14 = arith.addf %12, %13 : vector<10x256xf32>
    %cst_13 = arith.constant 5.000000e-01 : f32
    %15 = vector.broadcast %cst_13 : f32 to vector<10x256xf32>
    %16 = arith.mulf %15, %14 : vector<10x256xf32>
    %17 = math.tanh %16 : vector<10x256xf32>
    %cst_14 = arith.constant 1.000000e+00 : f32
    %18 = vector.broadcast %cst_14 : f32 to vector<10x256xf32>
    %19 = arith.addf %17, %18 : vector<10x256xf32>
    %cst_15 = arith.constant 5.000000e-01 : f32
    %20 = vector.broadcast %cst_15 : f32 to vector<10x256xf32>
    %21 = arith.mulf %20, %19 : vector<10x256xf32>
    %cst_16 = arith.constant dense<0.000000e+00> : vector<10x256xf32>
    %22 = tpu.matmul %3, %21, %cst_16 {dimension_numbers = #tpu.dot_dimension_numbers<[1], [0], [0], [1], [0, 0, 1, 1], [], []>} : vector<10x10xf32>, vector<10x256xf32>, vector<10x256xf32> -> vector<10x256xf32>
    %23 = vector.broadcast %4 : vector<10x1xf32> to vector<10x256xf32>
    %24 = arith.addf %22, %23 : vector<10x256xf32>
    %cst_17 = arith.constant 5.000000e-01 : f32
    %25 = vector.broadcast %cst_17 : f32 to vector<10x256xf32>
    %26 = arith.mulf %25, %24 : vector<10x256xf32>
    %27 = math.tanh %26 : vector<10x256xf32>
    %cst_18 = arith.constant 1.000000e+00 : f32
    %28 = vector.broadcast %cst_18 : f32 to vector<10x256xf32>
    %29 = arith.addf %27, %28 : vector<10x256xf32>
    %cst_19 = arith.constant 5.000000e-01 : f32
    %30 = vector.broadcast %cst_19 : f32 to vector<10x256xf32>
    %31 = arith.mulf %30, %29 : vector<10x256xf32>
    %cst_20 = arith.constant dense<0.000000e+00> : vector<3x256xf32>
    %32 = tpu.matmul %5, %31, %cst_20 {dimension_numbers = #tpu.dot_dimension_numbers<[1], [0], [0], [1], [0, 0, 1, 1], [], []>} : vector<3x10xf32>, vector<10x256xf32>, vector<3x256xf32> -> vector<3x256xf32>
    %33 = vector.broadcast %6 : vector<3x1xf32> to vector<3x256xf32>
    %34 = arith.addf %32, %33 : vector<3x256xf32>
    %c0_21 = arith.constant 0 : index
    %c0_22 = arith.constant 0 : index
    %35 = vector.load %arg8[%c0_21, %c0_22] : memref<3x256xf32, #tpu.memory_space<vmem>>, vector<3x256xf32>
    tpu.vector_store %arg8[%c0_21, %c0_22], %34 {strides = array<i32>} : memref<3x256xf32, #tpu.memory_space<vmem>>, vector<3x256xf32>,
    return
  }
  func.func @transform_0(%arg0: i32) -> (i32, i32) {
    %c0_i32 = arith.constant 0 : i32
    %c0_i32_0 = arith.constant 0 : i32
    return %c0_i32, %arg0 : i32, i32
  }
  func.func @transform_1(%arg0: i32) -> (i32, i32) {
    %c0_i32 = arith.constant 0 : i32
    %c0_i32_0 = arith.constant 0 : i32
    %c0_i32_1 = arith.constant 0 : i32
    return %c0_i32, %c0_i32_0 : i32, i32
  }
  func.func @transform_2(%arg0: i32) -> (i32, i32) {
    %c0_i32 = arith.constant 0 : i32
    %c0_i32_0 = arith.constant 0 : i32
    %c0_i32_1 = arith.constant 0 : i32
    return %c0_i32, %c0_i32_0 : i32, i32
  }
  func.func @transform_3(%arg0: i32) -> (i32, i32) {
    %c0_i32 = arith.constant 0 : i32
    %c0_i32_0 = arith.constant 0 : i32
    %c0_i32_1 = arith.constant 0 : i32
    return %c0_i32, %c0_i32_0 : i32, i32
  }
  func.func @transform_4(%arg0: i32) -> (i32, i32) {
    %c0_i32 = arith.constant 0 : i32
    %c0_i32_0 = arith.constant 0 : i32
    %c0_i32_1 = arith.constant 0 : i32
    return %c0_i32, %c0_i32_0 : i32, i32
  }
  func.func @transform_5(%arg0: i32) -> (i32, i32) {
    %c0_i32 = arith.constant 0 : i32
    %c0_i32_0 = arith.constant 0 : i32
    %c0_i32_1 = arith.constant 0 : i32
    return %c0_i32, %c0_i32_0 : i32, i32
  }
  func.func @transform_6(%arg0: i32) -> (i32, i32) {
    %c0_i32 = arith.constant 0 : i32
    %c0_i32_0 = arith.constant 0 : i32
    %c0_i32_1 = arith.constant 0 : i32
    return %c0_i32, %c0_i32_0 : i32, i32
  }
  func.func @transform_7(%arg0: i32) -> (i32, i32) {
    %c0_i32 = arith.constant 0 : i32
    %c0_i32_0 = arith.constant 0 : i32
    return %c0_i32, %arg0 : i32, i32
  }
}

</mosaic_0001>

<bundles_post_ra>
// kernel: tpu_custom_call.1
= control target key start
LH: loop header
LB: loop body
LE: loop exit
PB: predicated region body
PF: predicated region fallthrough
CT: control target
= control target key end

     0   :  { %v472_v2 = vmov 0   ;;  %s587_s0 = inlined_call_operand.vmem [shape: f32[1,256], index: 0, kind: input, shape index: {}]   ;;  %s588_s1 = inlined_call_operand.vmem [shape: f32[10,1], index: 1, kind: input, shape index: {}]   ;;  %s589_s2 = inlined_call_operand.vmem [shape: f32[10,1], index: 2, kind: input, shape index: {}]   ;;  %s590_s3 = inlined_call_operand.vmem [shape: f32[10,10], index: 3, kind: input, shape index: {}]   ;;  %s591_s4 = inlined_call_operand.vmem [shape: f32[10,1], index: 4, kind: input, shape index: {}]   ;;  %s592_s5 = inlined_call_operand.vmem [shape: f32[3,10], index: 5, kind: input, shape index: {}]   ;;  %s593_s6 = inlined_call_operand.vmem [shape: f32[3,1], index: 6, kind: input, shape index: {}]   ;;  %s594_s7 = inlined_call_operand.hbm [shape: f32[3,256], index: 7, kind: output, shape index: {}]  }
   0x1   :  { %v30_v0 = vld [vmem:[%s589_s2] sm:$0xff]  ;;  %431 = vset.pattern.permute.xlu1 %v472_v2  ;;  %430 = vset.pattern.permute.xlu0 %v472_v2  ;;  %v31_v3 = vld [vmem:[%s589_s2 + $0x8] sm:$0x3] }
   0x2   :  { %v28_v1 = vld [vmem:[%s588_s1] sm:$0xff]  ;;  %65 = vperm.xlu1 %431, %v30_v0   ;;  %v29_v4 = vld [vmem:[%s588_s1 + $0x8] sm:$0x3] }
   0x3   :  { %40 = vperm.xlu0 %430, %v28_v1  }
   0x4   :  { %12 = vsyncpa [#allocation3], 0  ;;  %v35_v5 = vld [vmem:[%s591_s4 + $0x8] sm:$0x3]  ;;  %v34_v6 = vld [vmem:[%s591_s4] sm:$0xff]  ;;  %v473_v8 = vmov 0.0   ;;  %v49_v9 = vlaneseq }
   0x5   :  { %v37_v7 = vld [vmem:[%s593_s6] sm:$0x7]  ;;  %165 = vmatprep.mubr.f32.mxu0 %v473_v8  ;;  %264 = vmatprep.mubr.f32.mxu1 %v473_v8  ;;  %vm94_vm0 = vcmask 1041408   ;;  %vm474_vm1 = vmmov 1   ;;  %vm87_vm3 = vcmask 80896   ;;  %s475_s17 = smov [#allocation2]  }
   0x6   :  { %70 = vperm.xlu1 %431, %v31_v3   ;;  %v50_v10 = vshrl.u32 %v49_v9, 7  ;;  %v27_v13 = vld [vmem:[%s587_s0] sm:$0x3]  ;;  %vm542_vm2 = vmpackc.low %vm94_vm0, %vm474_vm1  ;;  %v33_v32 = vld [vmem:[%s590_s3 + $0x8] sm:$0x3]  ;;  %s389_s18 = sshll.u32 %s475_s17, 4  ;;  %s390_s18 = int_to_ptr.vmem [resolvable:$true] %s389_s18 }
   0x7   :  { %45 = vperm.xlu0 %430, %v29_v4   ;;  %v32_v31 = vld [vmem:[%s590_s3] sm:$0xff]  ;;  %s448_s19 = scalar_lea.vmem %s390_s18, 128  ;;  %p453_p1 = scmp.lt.s32.totalorder %s390_s18, %s390_s18 }
   0x8   :  { %v51_v11 = vsub.s32 0, %v50_v10  ;;  %v55_v12 = vsub.s32 1, %v50_v10  ;;  %p449_p0 = scmp.ne.s32.totalorder %s390_s18, %s448_s19  ;;  %p454_p2 = scmp.lt.s32.totalorder %s448_s19, %s448_s19 }
   0xa   :  { %84 = vperm.xlu1 %431, %v35_v5   ;;  %v52_v14 = vrot.slane %v27_v13, %v51_v11  ;;  %v56_v15 = vrot.slane %v27_v13, %v55_v12  ;;  %p455_p3 = por %p454_p2, %p453_p1 }
   0xb   :  { %79 = vperm.xlu0 %430, %v34_v6  }
   0xc   :  { %p456_p4 = pnand %p455_p3, %p449_p0 }
   0xf   :  { %295 = vperm.xlu0 %430, %v37_v7  }
  0x81   :  { %v66_v16 = vpop.permute.xlu1 %65 }
  0x82   :  { %v41_v17 = vpop.permute.xlu0 %40 }
  0x83   :  { %v59_v18 = vmul.f32 %v52_v14, %v41_v17  ;;  %v60_v19 = vmul.f32 %v56_v15, %v41_v17 }
  0x85   :  { %v71_v23 = vpop.permute.xlu1 %70  ;;  %v73_v24 = vadd.f32 %v66_v16, %v59_v18  ;;  %v74_v26 = vadd.f32 %v66_v16, %v60_v19 }
  0x86   :  { %v46_v20 = vpop.permute.xlu0 %45 }
  0x87   :  { %v61_v21 = vmul.f32 %v52_v14, %v46_v20  ;;  %v62_v22 = vmul.f32 %v56_v15, %v46_v20 }
  0x89   :  { %v75_v25 = vadd.f32 %v71_v23, %v61_v21  ;;  %v76_v27 = vadd.f32 %v71_v23, %v62_v22  ;;  %v85_v39 = vpop.permute.xlu1 %84  ;;  %v36_v23 = vld [vmem:[%s592_s5] sm:$0x7] }
  0x8a   :  { %v80_v33 = vpop.permute.xlu0 %79 }
  0x8b   :  { %v408_v29 = vpack.c.bf16 %v76_v27, %v74_v26  ;;  %v411_v30 = vpack.c.bf16 %v75_v25, %v73_v24 }
  0x8d   :  { %410 = vmatprep.subr.msk.bf16.mxu0 %vm542_vm2, %v408_v29 }
  0x8e   :  { %413 = vmatpush1.bf16.msk.msra.mxu0 %vm542_vm2, %v411_v30  ;;  %v296_v24 = vpop.permute.xlu0 %295 }
  0x91   :  { %399 = vmatmul.mubr.msk.f32.vlgmr.msra.gmra.mrb[0].mxu0 %vm87_vm3, %v32_v31 }
  0x92   :  { %171 = vmatprep.mubr.f32.mxu0 %v473_v8 }
  0x95   :  { %400 = vmatmul.mubr.msk.f32.gmra.mrb[2].mxu0 %vm87_vm3, %v33_v32 }
  0x96   :  { %371 = vmatprep.mubr.f32.mxu0 %v473_v8 }
 0x164   :  { %v167_v34 = vpop.f32.mrb[0].mxu0 }
 0x165   :  { %v168_v35 = vadd.f32 %v167_v34, %v80_v33  ;;  %v169_v36 = vpop.f32.mrb[1].mxu0 }
 0x166   :  { %v170_v37 = vadd.f32 %v169_v36, %v80_v33 }
 0x167   :  { %v178_v38 = vmul.f32 0.5, %v168_v35 }
 0x168   :  { %v179_v40 = vmul.f32 0.5, %v170_v37  ;;  %v173_v41 = vpop.f32.mrb[2].mxu0 }
 0x169   :  { %432 = vtanh.f32 %v178_v38  ;;  %v174_v42 = vadd.f32 %v173_v41, %v85_v39  ;;  %v175_v43 = vpop.f32.mrb[3].mxu0 }
 0x16a   :  { %434 = vtanh.f32 %v179_v40  ;;  %v176_v44 = vadd.f32 %v175_v43, %v85_v39 }
 0x16b   :  { %v180_v45 = vmul.f32 0.5, %v174_v42 }
 0x16c   :  { %v181_v46 = vmul.f32 0.5, %v176_v44 }
 0x16d   :  { %436 = vtanh.f32 %v180_v45 }
 0x16e   :  { %438 = vtanh.f32 %v181_v46 }
 0x173   :  { %v433_v47 = vpop.eup %432 }
 0x174   :  { %v435_v48 = vpop.eup %434  ;;  %v186_v49 = vadd.f32 1.0, %v433_v47 }
 0x175   :  { %v187_v51 = vadd.f32 1.0, %v435_v48 }
 0x176   :  { %v190_v55 = vmul.f32 0.5, %v186_v49 }
 0x177   :  { %v437_v50 = vpop.eup %436  ;;  %v191_v57 = vmul.f32 0.5, %v187_v51 }
 0x178   :  { %v439_v52 = vpop.eup %438  ;;  %v188_v53 = vadd.f32 1.0, %v437_v50 }
 0x179   :  { %v189_v54 = vadd.f32 1.0, %v439_v52 }
 0x17a   :  { %v192_v56 = vmul.f32 0.5, %v188_v53 }
 0x17b   :  { %v193_v58 = vmul.f32 0.5, %v189_v54 }
 0x17c   :  { %v417_v59 = vpack.c.bf16 %v192_v56, %v190_v55 }
 0x17d   :  { %v414_v60 = vpack.c.bf16 %v193_v58, %v191_v57 }
 0x17f   :  { %416 = vmatprep.subr.msk.bf16.mxu1 %vm542_vm2, %v414_v60 }
 0x180   :  { %419 = vmatpush1.bf16.msk.msra.mxu1 %vm542_vm2, %v417_v59 }
 0x183   :  { %403 = vmatmul.mubr.msk.f32.vlgmr.msra.gmra.mrb[0].mxu1 %vm87_vm3, %v32_v31 }
 0x184   :  { %270 = vmatprep.mubr.f32.mxu1 %v473_v8 }
 0x187   :  { %404 = vmatmul.mubr.msk.f32.gmra.mrb[2].mxu1 %vm87_vm3, %v33_v32 }
 0x256   :  { %v266_v61 = vpop.f32.mrb[0].mxu1 }
 0x257   :  { %v267_v62 = vadd.f32 %v266_v61, %v80_v33  ;;  %v268_v63 = vpop.f32.mrb[1].mxu1 }
 0x258   :  { %v269_v0 = vadd.f32 %v268_v63, %v80_v33 }
 0x259   :  { %v277_v1 = vmul.f32 0.5, %v267_v62 }
 0x25a   :  { %v278_v2 = vmul.f32 0.5, %v269_v0  ;;  %v272_v3 = vpop.f32.mrb[2].mxu1 }
 0x25b   :  { %440 = vtanh.f32 %v277_v1  ;;  %v273_v4 = vadd.f32 %v272_v3, %v85_v39  ;;  %v274_v5 = vpop.f32.mrb[3].mxu1 }
 0x25c   :  { %442 = vtanh.f32 %v278_v2  ;;  %v275_v6 = vadd.f32 %v274_v5, %v85_v39 }
 0x25d   :  { %v279_v7 = vmul.f32 0.5, %v273_v4 }
 0x25e   :  { %v280_v9 = vmul.f32 0.5, %v275_v6 }
 0x25f   :  { %444 = vtanh.f32 %v279_v7 }
 0x260   :  { %446 = vtanh.f32 %v280_v9 }
 0x265   :  { %v441_v10 = vpop.eup %440 }
 0x266   :  { %v443_v8 = vpop.eup %442  ;;  %v285_v11 = vadd.f32 1.0, %v441_v10 }
 0x267   :  { %v286_v13 = vadd.f32 1.0, %v443_v8 }
 0x268   :  { %v289_v17 = vmul.f32 0.5, %v285_v11 }
 0x269   :  { %v445_v12 = vpop.eup %444  ;;  %v290_v19 = vmul.f32 0.5, %v286_v13 }
 0x26a   :  { %v447_v14 = vpop.eup %446  ;;  %v287_v15 = vadd.f32 1.0, %v445_v12 }
 0x26b   :  { %v288_v16 = vadd.f32 1.0, %v447_v14 }
 0x26c   :  { %v291_v18 = vmul.f32 0.5, %v287_v15 }
 0x26d   :  { %v292_v20 = vmul.f32 0.5, %v288_v16 }
 0x26e   :  { %v423_v21 = vpack.c.bf16 %v291_v18, %v289_v17 }
 0x26f   :  { %v420_v22 = vpack.c.bf16 %v292_v20, %v290_v19 }
 0x271   :  { %422 = vmatprep.subr.msk.bf16.mxu0 %vm542_vm2, %v420_v22 }
 0x272   :  { %425 = vmatpush1.bf16.msk.msra.mxu0 %vm542_vm2, %v423_v21 }
 0x275   :  { %407 = vmatmul.mubr.msk.f32.vlgmr.msra.gmra.mrb[4].mxu0 %vm87_vm3, %v36_v23 }
 0x348   :  { %v373_v25 = vpop.f32.mrb[4].mxu0 }
 0x349   :  { %v374_v26 = vadd.f32 %v373_v25, %v296_v24  ;;  %v375_v27 = vpop.f32.mrb[5].mxu0 }
 0x34a   :  { %v376_v29 = vadd.f32 %v375_v27, %v296_v24 }
 0x34c   :  { %v380_v30 = vcombine.low %v374_v26, %v376_v29 }
 0x34e   :  { %382 = vst [vmem:[#allocation2] sm:$0x77] %v380_v30 }
 0x34f   :  { %459 = shalt.err (!%p456_p4)
}
 0x350   :  { %s460_s21 = scalar_lea.hbm %s594_s7, 128 }
 0x351   :  { %p461_p5 = scmp.ne.s32.totalorder %s594_s7, %s460_s21  ;;  %p464_p6 = scmp.lt.u32.totalorder %s460_s21, %s594_s7 }
 0x353   :  { %p466_p7 = pnand %p464_p6, %p461_p5 }
 0x355   :  { %469 = shalt.err (!%p466_p7)
}
 0x356   :  { %392 = dma.vmem_to_hbm [thread:$0]  %s390_s18, 128, %s594_s7, [#allocation3]  }
 0x357   :  { %470 = dma.done.wait [#allocation3], 128  }
 0x358   :  { %471 = vsyncadd [#allocation3], 4294967168 }
 0x359   :  { %396 = vsyncpa [#allocation3], 1 }

</bundles_post_ra>
